<compile_context>
chip_gen: v7x
topology: tpu7x:2x2x1
jax: 0.10.0
libtpu: 0.0.40
codegen_flags: <defaults>
</compile_context>

<pallas_src>
import functools

import jax
import jax.numpy as jnp
from jax import lax
from jax.experimental import pallas as pl
from jax.experimental.pallas import tpu as pltpu


def _round_up(v, m):
    return ((v + m - 1) // m) * m


# ----------------------------- tiled matmul (QKV projection) ----------------------------- #

def _matmul_kernel(x_ref, w_ref, o_ref, acc_ref):
    # x: (bm, bk) bf16, w: (bk, bn) bf16, o: (bm, bn), acc: (bm, bn) f32
    @pl.when(pl.program_id(2) == 0)
    def _():
        acc_ref[...] = jnp.zeros_like(acc_ref)

    acc_ref[...] += jnp.dot(x_ref[...], w_ref[...],
                            preferred_element_type=jnp.float32)

    @pl.when(pl.program_id(2) == pl.num_programs(2) - 1)
    def _():
        o_ref[...] = acc_ref[...].astype(o_ref.dtype)


def _pallas_linear(x2d, w, *, out_dtype=jnp.float32, tm=256, tn=256, tk=256):
    """y = x2d @ w, tiled over (M, N, K) with an f32 VMEM accumulator."""
    M, K = x2d.shape
    Kw, N = w.shape
    assert K == Kw
    # Full-extent blocks when the dim is small; otherwise MXU-shaped tiles (pad to fit).
    bm = M if M <= tm else tm
    bn = N if N <= tn else tn
    bk = K if K <= tk else tk
    Mp, Np, Kp = _round_up(M, bm), _round_up(N, bn), _round_up(K, bk)
    xp = x2d if (Mp, Kp) == (M, K) else jnp.pad(x2d, ((0, Mp - M), (0, Kp - K)))
    wp = w if (Kp, Np) == (K, N) else jnp.pad(w, ((0, Kp - K), (0, Np - N)))
    grid = (Mp // bm, Np // bn, Kp // bk)

    cost = pl.CostEstimate(
        flops=2 * M * N * K,
        transcendentals=0,
        bytes_accessed=(M * K + K * N) * x2d.dtype.itemsize
        + M * N * jnp.dtype(out_dtype).itemsize,
    )

    out = pl.pallas_call(
        _matmul_kernel,
        out_shape=jax.ShapeDtypeStruct((Mp, Np), out_dtype),
        grid_spec=pltpu.PrefetchScalarGridSpec(
            num_scalar_prefetch=0,
            grid=grid,
            in_specs=[
                pl.BlockSpec((bm, bk), lambda i, j, k: (i, k)),
                pl.BlockSpec((bk, bn), lambda i, j, k: (k, j)),
            ],
            out_specs=pl.BlockSpec((bm, bn), lambda i, j, k: (i, j)),
            scratch_shapes=[pltpu.VMEM((bm, bn), jnp.float32)],
        ),
        compiler_params=pltpu.CompilerParams(
            dimension_semantics=("parallel", "parallel", "arbitrary")),
        cost_estimate=cost,
    )(xp, wp)

    if (Mp, Np) != (M, N):
        out = out[:M, :N]
    return out


# ------------------------ fused attention (+ optional out projection) -------------------- #

def _mha_heads(qkvb, heads, dim_head):
    """Multi-head attention on one batch's (N, 3*H*Dh) qkv block.

    The softmax scale is pre-folded into the Q weight columns (so q is already scaled).
    Returns (N, H*Dh) f32 in 'b n (h d)' column order (the torch rearrange is fused here).
    """
    inner = heads * dim_head
    outs = []
    for h in range(heads):
        lo = h * dim_head
        q = qkvb[:, lo:lo + dim_head]                          # (N, Dh) bf16, pre-scaled
        k = qkvb[:, inner + lo:inner + lo + dim_head]          # (N, Dh) bf16
        v = qkvb[:, 2 * inner + lo:2 * inner + lo + dim_head]  # (N, Dh) bf16
        # dots = q @ k^T expressed as a contraction (no materialized transpose).
        dots = lax.dot_general(q, k, (((1,), (1,)), ((), ())),
                               preferred_element_type=jnp.float32)   # (N, N) f32
        m = jnp.max(dots, axis=-1, keepdims=True)
        p = jnp.exp(dots - m)                                   # f32 softmax (v5e-safe)
        attn = p * pl.reciprocal(jnp.sum(p, axis=-1, keepdims=True), approx=True)
        outs.append(jnp.dot(attn.astype(v.dtype), v,
                            preferred_element_type=jnp.float32))     # (N, Dh) f32
    return jnp.concatenate(outs, axis=-1)                       # (N, H*Dh) f32


def _attn_kernel(qkv_ref, o_ref, *, heads, dim_head):
    # qkv: (1, N, 3*inner) bf16 -> o: (1, N, inner)
    att = _mha_heads(qkv_ref[0], heads, dim_head)
    o_ref[0] = att.astype(o_ref.dtype)


def _attn_out_kernel(qkv_ref, wo_ref, bo_ref, o_ref, *, heads, dim_head):
    # qkv: (1, N, 3*inner) bf16, wo: (inner, dim) bf16, bo: (1, dim) f32 -> o: (1, N, dim)
    att = _mha_heads(qkv_ref[0], heads, dim_head)
    proj = jnp.dot(att.astype(wo_ref.dtype), wo_ref[...],
                   preferred_element_type=jnp.float32) + bo_ref[...]
    o_ref[0] = proj.astype(o_ref.dtype)


def _pallas_attention(qkv, *, heads, dim_head, out_dtype=jnp.float32):
    B, N, three_inner = qkv.shape
    inner = heads * dim_head
    cost = pl.CostEstimate(
        flops=4 * B * heads * N * N * dim_head,
        transcendentals=B * heads * N * N,
        bytes_accessed=qkv.size * qkv.dtype.itemsize
        + B * N * inner * jnp.dtype(out_dtype).itemsize,
    )
    return pl.pallas_call(
        functools.partial(_attn_kernel, heads=heads, dim_head=dim_head),
        out_shape=jax.ShapeDtypeStruct((B, N, inner), out_dtype),
        grid_spec=pltpu.PrefetchScalarGridSpec(
            num_scalar_prefetch=0,
            grid=(B,),
            in_specs=[pl.BlockSpec((1, N, three_inner), lambda b: (b, 0, 0))],
            out_specs=pl.BlockSpec((1, N, inner), lambda b: (b, 0, 0)),
        ),
        compiler_params=pltpu.CompilerParams(dimension_semantics=("parallel",)),
        cost_estimate=cost,
    )(qkv)


def _pallas_attention_proj(qkv, w_out, b_out, *, heads, dim_head, out_dtype=jnp.float32):
    B, N, three_inner = qkv.shape
    inner = heads * dim_head
    dim = w_out.shape[1]
    cost = pl.CostEstimate(
        flops=B * (4 * heads * N * N * dim_head + 2 * N * inner * dim),
        transcendentals=B * heads * N * N,
        bytes_accessed=qkv.size * qkv.dtype.itemsize
        + w_out.size * w_out.dtype.itemsize
        + B * N * dim * jnp.dtype(out_dtype).itemsize,
    )
    return pl.pallas_call(
        functools.partial(_attn_out_kernel, heads=heads, dim_head=dim_head),
        out_shape=jax.ShapeDtypeStruct((B, N, dim), out_dtype),
        grid_spec=pltpu.PrefetchScalarGridSpec(
            num_scalar_prefetch=0,
            grid=(B,),
            in_specs=[
                pl.BlockSpec((1, N, three_inner), lambda b: (b, 0, 0)),
                pl.BlockSpec((inner, dim), lambda b: (0, 0)),   # weight stays resident
                pl.BlockSpec((1, dim), lambda b: (0, 0)),
            ],
            out_specs=pl.BlockSpec((1, N, dim), lambda b: (b, 0, 0)),
        ),
        compiler_params=pltpu.CompilerParams(dimension_semantics=("parallel",)),
        cost_estimate=cost,
    )(qkv, w_out, b_out.reshape(1, dim))


# --------------------------------------- module ------------------------------------------ #

class AttentionPallas:
    """Pallas port of the PyTorch ViT Attention module (dropout=0.0 / eval mode)."""

    def __init__(self, dim, heads=8, dim_head=64, dropout=0.0, key=None):
        inner_dim = dim_head * heads
        self.dim = dim
        self.heads = heads
        self.dim_head = dim_head
        self.inner_dim = inner_dim
        self.scale = dim_head ** (-0.5)
        self.project_out = not (heads == 1 and dim_head == dim)

        if key is None:
            key = jax.random.PRNGKey(0)
        k1, k2, k3 = jax.random.split(key, 3)
        # f32 master weights, pre-transposed: y = x @ W (torch does x @ W.T with W (out,in)).
        self.w_qkv = jax.random.normal(k1, (dim, inner_dim * 3), jnp.float32) * 0.02
        if self.project_out:
            self.w_out = jax.random.normal(k2, (inner_dim, dim), jnp.float32) * 0.02
            self.b_out = jax.random.normal(k3, (dim,), jnp.float32) * 0.02
        else:
            self.w_out = None
            self.b_out = None

        # bf16 kernel copies (halve HBM/VMEM traffic; MXU accumulates in f32).
        # Softmax scale folded into the Q columns of w_qkv -> free at runtime.
        w_q_scaled = self.w_qkv[:, :inner_dim] * self.scale
        self.w_qkv_k = jnp.concatenate(
            [w_q_scaled, self.w_qkv[:, inner_dim:]], axis=1).astype(jnp.bfloat16)
        self.w_out_k = self.w_out.astype(jnp.bfloat16) if self.project_out else None
        # TODO(synk): dropout is a no-op here (p=0.0 / eval mode), so it is not implemented.

    def __call__(self, x):
        b, n, d = x.shape
        # QKV projection: tiled bf16 matmul, bf16 output feeds attention directly.
        x2d = x.reshape(b * n, d).astype(jnp.bfloat16)
        qkv = _pallas_linear(x2d, self.w_qkv_k, out_dtype=jnp.bfloat16)   # (b*n, 3*inner)
        qkv = qkv.reshape(b, n, 3 * self.inner_dim)                       # free reshape

        if self.project_out:
            # Fused attention + output projection; output is lane-dense (b, n, dim).
            return _pallas_attention_proj(
                qkv, self.w_out_k, self.b_out,
                heads=self.heads, dim_head=self.dim_head, out_dtype=jnp.float32)
        return _pallas_attention(
            qkv, heads=self.heads, dim_head=self.dim_head, out_dtype=jnp.float32)


# -------------------------------------- reference ---------------------------------------- #

def _reference(x, mod: AttentionPallas):
    """Torch-faithful math (einsum attention), mirroring the kernel's bf16 cast points."""
    b, n, d = x.shape
    h, dh = mod.heads, mod.dim_head
    x2 = x.reshape(b * n, d).astype(jnp.bfloat16)
    qkv = jnp.dot(x2, mod.w_qkv.astype(jnp.bfloat16),
                  preferred_element_type=jnp.float32).astype(jnp.bfloat16)
    qkv = qkv.reshape(b, n, 3, h, dh).transpose(2, 0, 3, 1, 4)   # (3, b, h, n, dh)
    q, k, v = qkv[0], qkv[1], qkv[2]
    dots = jnp.einsum('bhid,bhjd->bhij', q, k,
                      preferred_element_type=jnp.float32) * mod.scale
    attn = jax.nn.softmax(dots, axis=-1)
    out = jnp.einsum('bhij,bhjd->bhid', attn.astype(jnp.bfloat16), v,
                     preferred_element_type=jnp.float32)
    out = out.transpose(0, 2, 1, 3).reshape(b, n, h * dh)
    if mod.project_out:
        out = jnp.dot(out.astype(jnp.bfloat16), mod.w_out.astype(jnp.bfloat16),
                      preferred_element_type=jnp.float32) + mod.b_out
    return out


if __name__ == "__main__":
    key = jax.random.PRNGKey(0)
    kx, kp = jax.random.split(key)

    # Small shapes consistent with the module's forward: x is (batch, seq, dim).
    B, N, DIM = 2, 8, 32
    HEADS, DIM_HEAD = 4, 16

    x = jax.random.normal(kx, (B, N, DIM), jnp.float32)
    mod = AttentionPallas(DIM, heads=HEADS, dim_head=DIM_HEAD, dropout=0.0, key=kp)

    y = jax.block_until_ready(mod(x))
    y_ref = _reference(x, mod)

    assert y.shape == (B, N, DIM), y.shape
    assert jnp.allclose(y, y_ref, atol=1e-2, rtol=1e-2), (
        "mismatch vs reference, max abs err = "
        f"{float(jnp.max(jnp.abs(y - y_ref)))}")

    print("KERNEL_OK")
</pallas_src>

<mosaic_0001>
module attributes {stable_mosaic.version = 11 : i64} {
  func.func @_matmul_kernel(%arg0: i32, %arg1: i32, %arg2: i32, %arg3: memref<16x32xbf16, #tpu.memory_space<vmem>>, %arg4: memref<32x192xbf16, #tpu.memory_space<vmem>>, %arg5: memref<16x192xbf16, #tpu.memory_space<vmem>>, %arg6: memref<16x192xf32, #tpu.memory_space<vmem>>) attributes {dimension_semantics = [#tpu.dimension_semantics<parallel>, #tpu.dimension_semantics<parallel>, #tpu.dimension_semantics<arbitrary>], iteration_bounds = array<i64: 1, 1, 1>, scalar_prefetch = 0 : i64, scratch_operands = 1 : i64, tpu.core_type = #tpu.core_type<tc>, window_params = [{transform_indices = @transform_0, window_bounds = array<i64: 16, 32>}, {transform_indices = @transform_1, window_bounds = array<i64: 32, 192>}, {transform_indices = @transform_2, window_bounds = array<i64: 16, 192>}]} {
    %c0_i32 = arith.constant 0 : i32
    %0 = arith.cmpi eq, %arg2, %c0_i32 : i32
    %1 = arith.extui %0 : i1 to i32
    %c0_i32_0 = arith.constant 0 : i32
    %2 = arith.cmpi ne, %1, %c0_i32_0 : i32
    scf.if %2 {
      %cst_10 = arith.constant 0.000000e+00 : f32
      %12 = vector.broadcast %cst_10 : f32 to vector<16x192xf32>
      %c0_11 = arith.constant 0 : index
      %c0_12 = arith.constant 0 : index
      %13 = vector.load %arg6[%c0_11, %c0_12] : memref<16x192xf32, #tpu.memory_space<vmem>>, vector<16x192xf32>
      tpu.vector_store %arg6[%c0_11, %c0_12], %12 {strides = array<i32>} : memref<16x192xf32, #tpu.memory_space<vmem>>, vector<16x192xf32>,
    } else {
    }
    %c0 = arith.constant 0 : index
    %c0_1 = arith.constant 0 : index
    %3 = vector.load %arg6[%c0, %c0_1] : memref<16x192xf32, #tpu.memory_space<vmem>>, vector<16x192xf32>
    %c0_2 = arith.constant 0 : index
    %c0_3 = arith.constant 0 : index
    %4 = vector.load %arg3[%c0_2, %c0_3] : memref<16x32xbf16, #tpu.memory_space<vmem>>, vector<16x32xbf16>
    %c0_4 = arith.constant 0 : index
    %c0_5 = arith.constant 0 : index
    %5 = vector.load %arg4[%c0_4, %c0_5] : memref<32x192xbf16, #tpu.memory_space<vmem>>, vector<32x192xbf16>
    %cst = arith.constant dense<0.000000e+00> : vector<16x192xf32>
    %6 = tpu.matmul %4, %5, %cst {dimension_numbers = #tpu.dot_dimension_numbers<[1], [0], [0], [1], [0, 0, 1, 1], [], []>} : vector<16x32xbf16>, vector<32x192xbf16>, vector<16x192xf32> -> vector<16x192xf32>
    %7 = arith.addf %3, %6 : vector<16x192xf32>
    %c0_6 = arith.constant 0 : index
    %c0_7 = arith.constant 0 : index
    %8 = vector.load %arg6[%c0_6, %c0_7] : memref<16x192xf32, #tpu.memory_space<vmem>>, vector<16x192xf32>
    tpu.vector_store %arg6[%c0_6, %c0_7], %7 {strides = array<i32>} : memref<16x192xf32, #tpu.memory_space<vmem>>, vector<16x192xf32>,
    %c0_i32_8 = arith.constant 0 : i32
    %9 = arith.cmpi eq, %arg2, %c0_i32_8 : i32
    %10 = arith.extui %9 : i1 to i32
    %c0_i32_9 = arith.constant 0 : i32
    %11 = arith.cmpi ne, %10, %c0_i32_9 : i32
    scf.if %11 {
      %c0_10 = arith.constant 0 : index
      %c0_11 = arith.constant 0 : index
      %12 = vector.load %arg6[%c0_10, %c0_11] : memref<16x192xf32, #tpu.memory_space<vmem>>, vector<16x192xf32>
      %13 = arith.truncf %12 : vector<16x192xf32> to vector<16x192xbf16>
      %c0_12 = arith.constant 0 : index
      %c0_13 = arith.constant 0 : index
      %14 = vector.load %arg5[%c0_12, %c0_13] : memref<16x192xbf16, #tpu.memory_space<vmem>>, vector<16x192xbf16>
      tpu.vector_store %arg5[%c0_12, %c0_13], %13 {strides = array<i32>} : memref<16x192xbf16, #tpu.memory_space<vmem>>, vector<16x192xbf16>,
    } else {
    }
    return
  }
  func.func @transform_0(%arg0: i32, %arg1: i32, %arg2: i32) -> (i32, i32) {
    %c0_i32 = arith.constant 0 : i32
    return %arg0, %arg2 : i32, i32
  }
  func.func @transform_1(%arg0: i32, %arg1: i32, %arg2: i32) -> (i32, i32) {
    %c0_i32 = arith.constant 0 : i32
    return %arg2, %arg1 : i32, i32
  }
  func.func @transform_2(%arg0: i32, %arg1: i32, %arg2: i32) -> (i32, i32) {
    %c0_i32 = arith.constant 0 : i32
    return %arg0, %arg1 : i32, i32
  }
}

</mosaic_0001>

<bundles_post_ra>
// kernel: tpu_custom_call.1
= control target key start
LH: loop header
LB: loop body
LE: loop exit
PB: predicated region body
PF: predicated region fallthrough
CT: control target
= control target key end

     0   :  { %7 = vsyncpa [#allocation4], 0  ;;  %s347_s0 = inlined_call_operand.hbm [shape: bf16[16,32], index: 0, kind: input, shape index: {}]   ;;  %s348_s1 = inlined_call_operand.hbm [shape: bf16[32,192], index: 1, kind: input, shape index: {}]   ;;  %s349_s2 = inlined_call_operand.hbm [shape: bf16[16,192], index: 2, kind: output, shape index: {}]  }
   0x1   :  { %8 = vsyncpa [#allocation7], 0 }
   0x2   :  { %9 = vsyncpa [#allocation5], 0  ;;  %s281_s9 = smov [#allocation3]   ;;  %s209_s13 = scalar_lea.hbm %s347_s0, 128 }
   0x3   :  { %s15_s10 = sshll.u32 %s281_s9, 4  ;;  %p210_p0 = scmp.ne.s32.totalorder %s347_s0, %s209_s13  ;;  %s16_s10 = int_to_ptr.vmem [resolvable:$true] %s15_s10 }
   0x4   :  { %p213_p1 = scmp.lt.u32.totalorder %s209_s13, %s347_s0 }
   0x6   :  { %p215_p2 = pnand %p213_p1, %p210_p0 }
   0x8   :  { %218 = shalt.err (!%p215_p2)
}
   0x9   :  { %s219_s18 = scalar_lea.vmem %s16_s10, 128  ;;  %p224_p4 = scmp.lt.s32.totalorder %s16_s10, %s16_s10 }
   0xa   :  { %p220_p3 = scmp.ne.s32.totalorder %s16_s10, %s219_s18  ;;  %p225_p5 = scmp.lt.s32.totalorder %s219_s18, %s219_s18 }
   0xc   :  { %p226_p6 = por %p225_p5, %p224_p4 }
   0xe   :  { %p227_p7 = pnand %p226_p6, %p220_p3 }
  0x10   :  { %230 = shalt.err (!%p227_p7)
}
  0x11   :  { %s282_s19 = smov 64   ;;  %s283_s20 = smov 4  }
  0x12   :  { %21 = dma.hbm_to_vmem [thread:$0]  %s347_s0, 128, %s16_s10, [#allocation4], %s282_s19, %s282_s19, %s283_s20  }
  0x13   :  { %s284_s23 = smov [#allocation6]   ;;  %s231_s27 = scalar_lea.hbm %s348_s1, 512 }
  0x14   :  { %s27_s24 = sshll.u32 %s284_s23, 4  ;;  %p232_p8 = scmp.ne.s32.totalorder %s348_s1, %s231_s27  ;;  %s28_s24 = int_to_ptr.vmem [resolvable:$true] %s27_s24 }
  0x15   :  { %p235_p9 = scmp.lt.u32.totalorder %s231_s27, %s348_s1 }
  0x17   :  { %p237_p10 = pnand %p235_p9, %p232_p8 }
  0x19   :  { %240 = shalt.err (!%p237_p10)
}
  0x1a   :  { %s241_s4 = scalar_lea.vmem %s28_s24, 512  ;;  %p246_p12 = scmp.lt.s32.totalorder %s28_s24, %s28_s24 }
  0x1b   :  { %p242_p11 = scmp.ne.s32.totalorder %s28_s24, %s241_s4  ;;  %p247_p13 = scmp.lt.s32.totalorder %s241_s4, %s241_s4 }
  0x1d   :  { %p248_p0 = por %p247_p13, %p246_p12 }
  0x1f   :  { %p249_p1 = pnand %p248_p0, %p242_p11 }
  0x21   :  { %252 = shalt.err (!%p249_p1)
}
  0x22   :  { %s285_s0 = smov 128   ;;  %s286_s5 = smov 8  }
  0x23   :  { %33 = dma.hbm_to_vmem [thread:$0]  %s348_s1, 512, %s28_s24, [#allocation7], %s285_s0, %s285_s0, %s286_s5  }
  0x24   :  { %275 = dma.done.wait [#allocation4], 128  }
  0x25   :  { %276 = vsyncadd [#allocation4], 4294967168 }
  0x26   :  { %277 = dma.done.wait [#allocation7], 512  }
  0x27   :  { %278 = vsyncadd [#allocation7], 4294966784  ;;  %v287_v0 = vmov 0   ;;  %v202_v1 = vld [vmem:[#allocation6 + $0x4] ss:$8 sps:$4 sm:$0xff]   ;;  %v208_v5 = vld [vmem:[#allocation3] sm:$0xff]  }
  0x28   :  { %121 = vmatprep.mubr.bf16.mxu0 %v287_v0  ;;  %v204_v2 = vld [vmem:[#allocation6] ss:$8 sps:$4 sm:$0xff]   ;;  %89 = vmatprep.subr.bf16.mxu0 %v202_v1  ;;  %v205_v3 = vld [vmem:[#allocation6 + $0x14] ss:$8 sps:$4 sm:$0xff]   ;;  %v207_v4 = vld [vmem:[#allocation6 + $0x10] ss:$8 sps:$4 sm:$0xff]  }
  0x29   :  { %90 = vmatpush1.bf16.msra.mxu0 %v204_v2  ;;  %vm85_vm0 = vcmask 261120   ;;  %vm46_vm1 = vcmask 523264   ;;  %v288_v6 = vmov 0.0   ;;  %vm160_vm2 = vcmask 1043456   ;;  %s289_s1 = smov [#allocation8]  }
  0x2a   :  { %91 = vmatprep.subr.bf16.mxu0 %v205_v3  ;;  %47 = vst.msk [vmem:[#allocation2 + $0x8] sm:$0xff] %vm46_vm1, %v288_v6  ;;  %49 = vst.msk [vmem:[#allocation2 + $0x18] sm:$0xff] %vm46_vm1, %v288_v6  ;;  %vm161_vm3 = vcmask 523268   ;;  %s170_s8 = sshll.u32 %s289_s1, 4  ;;  %s171_s8 = int_to_ptr.vmem [resolvable:$true] %s170_s8 }
  0x2b   :  { %vm162_vm4 = vmor %vm161_vm3, %vm160_vm2  ;;  %s253_s9 = scalar_lea.vmem %s171_s8, 256  ;;  %p258_p3 = scmp.lt.s32.totalorder %s171_s8, %s171_s8 }
  0x2c   :  { %p254_p2 = scmp.ne.s32.totalorder %s171_s8, %s253_s9  ;;  %p259_p4 = scmp.lt.s32.totalorder %s253_s9, %s253_s9 }
  0x2d   :  { %92 = vmatpush1.bf16.msra.mxu0 %v207_v4 }
  0x2e   :  { %p260_p5 = por %p259_p4, %p258_p3 }
  0x30   :  { %188 = vmatmul.mubr.msk.bf16.vlgmr.msra.gmra.mrb[0].mxu0 %vm85_vm0, %v208_v5  ;;  %p261_p6 = pnand %p260_p5, %p254_p2 }
  0x31   :  { %v51_v7 = vld [vmem:[#allocation2 + $0x8] sm:$0xff]  ;;  %v53_v10 = vld [vmem:[#allocation2 + $0x18] sm:$0xff] }
 0x103   :  { %v123_v8 = vpop.f32.mrb[0].mxu0 }
 0x104   :  { %v125_v9 = vpop.f32.mrb[1].mxu0 }
 0x105   :  { %v133_v11 = vadd.f32 %v125_v9, %v51_v7  ;;  %v127_v12 = vpop.f32.mrb[2].mxu0 }
 0x106   :  { %v129_v13 = vpop.f32.mrb[3].mxu0 }
 0x107   :  { %138 = vst.msk [vmem:[#allocation2 + $0x8] sm:$0xff] %vm46_vm1, %v133_v11  ;;  %v135_v14 = vadd.f32 %v129_v13, %v53_v10 }
 0x109   :  { %140 = vst.msk [vmem:[#allocation2 + $0x18] sm:$0xff] %vm46_vm1, %v135_v14 }
 0x10e   :  { %v145_v15 = vld [vmem:[#allocation2 + $0x8] sm:$0xff] }
 0x10f   :  { %v191_v16 = vpack.c.bf16 %v145_v15, %v123_v8 }
 0x110   :  { %v147_v17 = vld [vmem:[#allocation2 + $0x18] sm:$0xff] }
 0x111   :  { %v192_v18 = vpack.c.bf16 %v147_v17, %v127_v12  ;;  %163 = vst.msk [vmem:[#allocation8] sm:$0xff] %vm162_vm4, %v191_v16 }
 0x113   :  { %164 = vst.msk [vmem:[#allocation8 + $0x8] sm:$0xff] %vm162_vm4, %v192_v18 }
 0x114   :  { %264 = shalt.err (!%p261_p6)
}
 0x115   :  { %s265_s12 = scalar_lea.hbm %s349_s2, 256 }
 0x116   :  { %p266_p7 = scmp.ne.s32.totalorder %s349_s2, %s265_s12  ;;  %p269_p8 = scmp.lt.u32.totalorder %s265_s12, %s349_s2 }
 0x118   :  { %p271_p9 = pnand %p269_p8, %p266_p7 }
 0x11a   :  { %274 = shalt.err (!%p271_p9)
}
 0x11b   :  { %176 = dma.vmem_to_hbm [thread:$0]  %s171_s8, 256, %s349_s2, [#allocation5], %s285_s0, %s285_s0, %s286_s5  }
 0x11c   :  { %279 = dma.done.wait [#allocation5], 256  }
 0x11d   :  { %280 = vsyncadd [#allocation5], 4294967040 }
 0x11e   :  { %180 = vsyncpa [#allocation4], 1 }
 0x11f   :  { %181 = vsyncpa [#allocation7], 1 }
 0x120   :  { %182 = vsyncpa [#allocation5], 1 }

</bundles_post_ra>
